<compile_context>
chip_gen: v7x
topology: tpu7x:2x2x1
jax: 0.10.0
libtpu: 0.0.40
codegen_flags: <defaults>
</compile_context>

<pallas_src>
import jax
import jax.numpy as jnp
from jax import lax
from jax.experimental import pallas as pl
from jax.experimental.pallas import tpu as pltpu


def _round_up(x, m):
    return (x + m - 1) // m * m


def _pad2d(a, rows, cols):
    pr, pc = rows - a.shape[0], cols - a.shape[1]
    if pr or pc:
        a = jnp.pad(a, ((0, pr), (0, pc)))
    return a


def lora_kernel(x_ref, w_ref, a_ref, wb_ref, o_ref, acc_ref):
    """One (i, j) output tile, accumulated over the K (d_in) grid axis.

    x_ref : (tm, tk)   row/K tile of the input
    w_ref : (tn, tk)   PyTorch-layout panel of W  (out, in)
    a_ref : (tm, r)    precomputed LoRA intermediate  a = x @ Wa^T
    wb_ref: (tn, r)    PyTorch-layout panel of Wb (out, r)
    o_ref : (tm, tn)
    acc_ref: (tm, tn) f32 scratch - base-matmul accumulator
    """
    k = pl.program_id(2)
    nk = pl.num_programs(2)

    @pl.when(k == 0)
    def _init():
        acc_ref[...] = jnp.zeros_like(acc_ref)

    # base: x @ W^T  (contract last dims of both -> (tm, tn)), f32 accumulate.
    acc_ref[...] += lax.dot_general(
        x_ref[...], w_ref[...],
        dimension_numbers=(((1,), (1,)), ((), ())),
        preferred_element_type=jnp.float32)

    @pl.when(k == nk - 1)
    def _finalize():
        # LoRA B: a @ Wb^T -> (tm, tn); compute-dtype operands, f32 accumulate.
        lora = lax.dot_general(
            a_ref[...], wb_ref[...],
            dimension_numbers=(((1,), (1,)), ((), ())),
            preferred_element_type=jnp.float32)
        o_ref[...] = (acc_ref[...] + lora).astype(o_ref.dtype)


def lora_forward(x, w, w_a, w_b, *, tm=1024, tn=1024, tk=1024,
                 compute_dtype=jnp.bfloat16):
    """x: (B, S, d_in); w: (d_out, d_in); w_a: (r, d_in); w_b: (d_out, r).
    Returns (B, S, d_out) = x @ w.T + (x @ w_a.T) @ w_b.T  in x's original dtype.
    Weights are consumed in PyTorch layout (no transposes materialized).
    """
    B, S, d_in = x.shape
    d_out = w.shape[0]
    r = w_a.shape[0]

    out_dtype = x.dtype  # capture BEFORE any compute-dtype cast

    if compute_dtype is not None:
        x, w, w_a, w_b = (a.astype(compute_dtype) for a in (x, w, w_a, w_b))

    M = B * S
    x2 = x.reshape(M, d_in)

    # LoRA A intermediate, computed once (M x r, tiny): f32 accumulate, then
    # cast to the compute dtype so the in-kernel B matmul runs at MXU rate.
    a = lax.dot_general(
        x2, w_a,
        dimension_numbers=(((1,), (1,)), ((), ())),
        preferred_element_type=jnp.float32).astype(x2.dtype)

    # Sublane packing: 8 rows for 4-byte dtypes, 16 for 2-byte, 32 for 1-byte.
    sub = {1: 32, 2: 16, 4: 8}[jnp.dtype(x2.dtype).itemsize]

    # Clamp tiles for small problems, keep them legal ((8,128)-aligned).
    tm_e = min(_round_up(tm, sub), _round_up(M, sub))
    tk_e = min(_round_up(tk, 128), _round_up(d_in, 128))
    tn_e = min(_round_up(tn, 128), _round_up(d_out, 128))

    M_p = _round_up(M, tm_e)
    K_p = _round_up(d_in, tk_e)
    N_p = _round_up(d_out, tn_e)

    # Zero-pad to tile multiples (zeros contribute nothing to the matmuls).
    x2p = _pad2d(x2, M_p, K_p)
    w_p = _pad2d(w, N_p, K_p)
    a_p = _pad2d(a, M_p, r)
    wb_p = _pad2d(w_b, N_p, r)

    grid = (M_p // tm_e, N_p // tn_e, K_p // tk_e)

    in_bytes = jnp.dtype(x2p.dtype).itemsize
    out_bytes = jnp.dtype(out_dtype).itemsize
    cost = pl.CostEstimate(
        flops=2 * M * d_out * d_in + 2 * M * d_out * r,
        transcendentals=0,
        bytes_accessed=(x2p.size + w_p.size + a_p.size + wb_p.size) * in_bytes
                       + M_p * N_p * out_bytes,
    )

    out = pl.pallas_call(
        lora_kernel,
        out_shape=jax.ShapeDtypeStruct((M_p, N_p), out_dtype),
        grid_spec=pltpu.PrefetchScalarGridSpec(
            num_scalar_prefetch=0,
            grid=grid,
            in_specs=[
                pl.BlockSpec((tm_e, tk_e), lambda i, j, k: (i, k)),  # x rows/K
                pl.BlockSpec((tn_e, tk_e), lambda i, j, k: (j, k)),  # W panel
                pl.BlockSpec((tm_e, r), lambda i, j, k: (i, 0)),     # a rows
                pl.BlockSpec((tn_e, r), lambda i, j, k: (j, 0)),     # Wb panel
            ],
            out_specs=pl.BlockSpec((tm_e, tn_e), lambda i, j, k: (i, j)),
            scratch_shapes=[
                pltpu.VMEM((tm_e, tn_e), jnp.float32),  # base accumulator
            ],
        ),
        compiler_params=pltpu.CompilerParams(
            dimension_semantics=("parallel", "parallel", "arbitrary"),
            vmem_limit_bytes=48 * 1024 * 1024,
        ),
        cost_estimate=cost,
    )(x2p, w_p, a_p, wb_p)

    return out[:M, :d_out].reshape(B, S, d_out)


if __name__ == "__main__":
    # Small demo shapes: batch=2, seq=8, hidden=32, LoRA rank r=4.
    B, S, D_IN, D_OUT, R = 2, 8, 32, 32, 4

    key = jax.random.PRNGKey(0)
    kx, kw, ka, kb = jax.random.split(key, 4)

    x = jax.random.normal(kx, (B, S, D_IN), dtype=jnp.float32)
    # PyTorch nn.Linear weight layout: (out_features, in_features), no bias.
    w = jax.random.normal(kw, (D_OUT, D_IN), dtype=jnp.float32) * 0.05
    w_a = jax.random.normal(ka, (R, D_IN), dtype=jnp.float32) * 0.05
    w_b = jax.random.normal(kb, (D_OUT, R), dtype=jnp.float32) * 0.05

    # Pure-JAX reference.
    ref = x @ w.T + (x @ w_a.T) @ w_b.T

    # 1) f32 compute path: tight check.
    out_f32 = jax.block_until_ready(
        lora_forward(x, w, w_a, w_b, compute_dtype=jnp.float32))
    assert out_f32.shape == ref.shape
    assert out_f32.dtype == x.dtype
    assert jnp.allclose(out_f32, ref, atol=1e-5, rtol=1e-5), "f32 mismatch"

    # 2) default bf16 compute path: output dtype preserved, loose tolerance.
    out_bf16 = jax.block_until_ready(lora_forward(x, w, w_a, w_b))
    assert out_bf16.shape == ref.shape
    assert out_bf16.dtype == x.dtype  # original dtype preserved
    assert jnp.allclose(out_bf16, ref, atol=5e-2, rtol=5e-2), "bf16 mismatch"

    print("KERNEL_OK")
</pallas_src>

<mosaic_0001>
module attributes {stable_mosaic.version = 11 : i64} {
  func.func @lora_kernel(%arg0: i32, %arg1: i32, %arg2: i32, %arg3: memref<16x128xf32, #tpu.memory_space<vmem>>, %arg4: memref<128x128xf32, #tpu.memory_space<vmem>>, %arg5: memref<16x4xf32, #tpu.memory_space<vmem>>, %arg6: memref<128x4xf32, #tpu.memory_space<vmem>>, %arg7: memref<16x128xf32, #tpu.memory_space<vmem>>, %arg8: memref<16x128xf32, #tpu.memory_space<vmem>>) attributes {dimension_semantics = [#tpu.dimension_semantics<parallel>, #tpu.dimension_semantics<parallel>, #tpu.dimension_semantics<arbitrary>], iteration_bounds = array<i64: 1, 1, 1>, scalar_prefetch = 0 : i64, scratch_operands = 1 : i64, tpu.core_type = #tpu.core_type<tc>, window_params = [{transform_indices = @transform_0, window_bounds = array<i64: 16, 128>}, {transform_indices = @transform_1, window_bounds = array<i64: 128, 128>}, {transform_indices = @transform_2, window_bounds = array<i64: 16, 4>}, {transform_indices = @transform_3, window_bounds = array<i64: 128, 4>}, {transform_indices = @transform_4, window_bounds = array<i64: 16, 128>}]} {
    %c0_i32 = arith.constant 0 : i32
    %0 = arith.cmpi eq, %arg2, %c0_i32 : i32
    %1 = arith.extui %0 : i1 to i32
    %c0_i32_0 = arith.constant 0 : i32
    %2 = arith.cmpi ne, %1, %c0_i32_0 : i32
    scf.if %2 {
      %cst_10 = arith.constant 0.000000e+00 : f32
      %12 = vector.broadcast %cst_10 : f32 to vector<16x128xf32>
      %c0_11 = arith.constant 0 : index
      %c0_12 = arith.constant 0 : index
      %13 = vector.load %arg8[%c0_11, %c0_12] : memref<16x128xf32, #tpu.memory_space<vmem>>, vector<16x128xf32>
      tpu.vector_store %arg8[%c0_11, %c0_12], %12 {strides = array<i32>} : memref<16x128xf32, #tpu.memory_space<vmem>>, vector<16x128xf32>,
    } else {
    }
    %c0 = arith.constant 0 : index
    %c0_1 = arith.constant 0 : index
    %3 = vector.load %arg8[%c0, %c0_1] : memref<16x128xf32, #tpu.memory_space<vmem>>, vector<16x128xf32>
    %c0_2 = arith.constant 0 : index
    %c0_3 = arith.constant 0 : index
    %4 = vector.load %arg3[%c0_2, %c0_3] : memref<16x128xf32, #tpu.memory_space<vmem>>, vector<16x128xf32>
    %c0_4 = arith.constant 0 : index
    %c0_5 = arith.constant 0 : index
    %5 = vector.load %arg4[%c0_4, %c0_5] : memref<128x128xf32, #tpu.memory_space<vmem>>, vector<128x128xf32>
    %cst = arith.constant dense<0.000000e+00> : vector<16x128xf32>
    %6 = tpu.matmul %4, %5, %cst {dimension_numbers = #tpu.dot_dimension_numbers<[1], [1], [0], [0], [0, 0, 1, 0], [], []>} : vector<16x128xf32>, vector<128x128xf32>, vector<16x128xf32> -> vector<16x128xf32>
    %7 = arith.addf %3, %6 : vector<16x128xf32>
    %c0_6 = arith.constant 0 : index
    %c0_7 = arith.constant 0 : index
    %8 = vector.load %arg8[%c0_6, %c0_7] : memref<16x128xf32, #tpu.memory_space<vmem>>, vector<16x128xf32>
    tpu.vector_store %arg8[%c0_6, %c0_7], %7 {strides = array<i32>} : memref<16x128xf32, #tpu.memory_space<vmem>>, vector<16x128xf32>,
    %c0_i32_8 = arith.constant 0 : i32
    %9 = arith.cmpi eq, %arg2, %c0_i32_8 : i32
    %10 = arith.extui %9 : i1 to i32
    %c0_i32_9 = arith.constant 0 : i32
    %11 = arith.cmpi ne, %10, %c0_i32_9 : i32
    scf.if %11 {
      %c0_10 = arith.constant 0 : index
      %c0_11 = arith.constant 0 : index
      %12 = vector.load %arg5[%c0_10, %c0_11] : memref<16x4xf32, #tpu.memory_space<vmem>>, vector<16x4xf32>
      %c0_12 = arith.constant 0 : index
      %c0_13 = arith.constant 0 : index
      %13 = vector.load %arg6[%c0_12, %c0_13] : memref<128x4xf32, #tpu.memory_space<vmem>>, vector<128x4xf32>
      %cst_14 = arith.constant dense<0.000000e+00> : vector<16x128xf32>
      %14 = tpu.matmul %12, %13, %cst_14 {dimension_numbers = #tpu.dot_dimension_numbers<[1], [1], [0], [0], [0, 0, 1, 0], [], []>} : vector<16x4xf32>, vector<128x4xf32>, vector<16x128xf32> -> vector<16x128xf32>
      %c0_15 = arith.constant 0 : index
      %c0_16 = arith.constant 0 : index
      %15 = vector.load %arg8[%c0_15, %c0_16] : memref<16x128xf32, #tpu.memory_space<vmem>>, vector<16x128xf32>
      %16 = arith.addf %15, %14 : vector<16x128xf32>
      %c0_17 = arith.constant 0 : index
      %c0_18 = arith.constant 0 : index
      %17 = vector.load %arg7[%c0_17, %c0_18] : memref<16x128xf32, #tpu.memory_space<vmem>>, vector<16x128xf32>
      tpu.vector_store %arg7[%c0_17, %c0_18], %16 {strides = array<i32>} : memref<16x128xf32, #tpu.memory_space<vmem>>, vector<16x128xf32>,
    } else {
    }
    return
  }
  func.func @transform_0(%arg0: i32, %arg1: i32, %arg2: i32) -> (i32, i32) {
    %c0_i32 = arith.constant 0 : i32
    return %arg0, %arg2 : i32, i32
  }
  func.func @transform_1(%arg0: i32, %arg1: i32, %arg2: i32) -> (i32, i32) {
    %c0_i32 = arith.constant 0 : i32
    return %arg1, %arg2 : i32, i32
  }
  func.func @transform_2(%arg0: i32, %arg1: i32, %arg2: i32) -> (i32, i32) {
    %c0_i32 = arith.constant 0 : i32
    %c0_i32_0 = arith.constant 0 : i32
    return %arg0, %c0_i32 : i32, i32
  }
  func.func @transform_3(%arg0: i32, %arg1: i32, %arg2: i32) -> (i32, i32) {
    %c0_i32 = arith.constant 0 : i32
    %c0_i32_0 = arith.constant 0 : i32
    return %arg1, %c0_i32 : i32, i32
  }
  func.func @transform_4(%arg0: i32, %arg1: i32, %arg2: i32) -> (i32, i32) {
    %c0_i32 = arith.constant 0 : i32
    return %arg0, %arg1 : i32, i32
  }
}

</mosaic_0001>

<bundles_post_ra>
// kernel: tpu_custom_call.1
= control target key start
LH: loop header
LB: loop body
LE: loop exit
PB: predicated region body
PF: predicated region fallthrough
CT: control target
= control target key end

     0   :  { %vm144_vm0 = vcmask 31744   ;;  %s717_s0 = inlined_call_operand.vmem [shape: f32[16,128], index: 0, kind: input, shape index: {}]   ;;  %s718_s1 = inlined_call_operand.vmem [shape: f32[128,128], index: 1, kind: input, shape index: {}]   ;;  %s719_s2 = inlined_call_operand.vmem [shape: f32[16,4], index: 2, kind: input, shape index: {}]   ;;  %s720_s3 = inlined_call_operand.vmem [shape: f32[128,4], index: 3, kind: input, shape index: {}]   ;;  %s721_s4 = inlined_call_operand.hbm [shape: f32[16,128], index: 4, kind: output, shape index: {}]  }
   0x1   :  { %v28_v0 = vld [vmem:[%s718_s1] sm:$0xff]  ;;  %v29_v1 = vld [vmem:[%s718_s1 + $0x8] sm:$0xff]  ;;  %vm571_vm1 = vmpackc.low %vm144_vm0, %vm144_vm0 }
   0x2   :  { %v128_v2 = vld [vmem:[%s720_s3] sm:$0xff]  ;;  %v420_v3 = vpack.c.bf16 %v29_v1, %v28_v0  ;;  %v129_v4 = vld [vmem:[%s720_s3 + $0x8] sm:$0xff]  ;;  %v30_v6 = vld [vmem:[%s718_s1 + $0x10] sm:$0xff] }
   0x3   :  { %v452_v7 = vpack.c.bf16 %v129_v4, %v128_v2  ;;  %v31_v8 = vld [vmem:[%s718_s1 + $0x18] sm:$0xff]  ;;  %v130_v9 = vld [vmem:[%s720_s3 + $0x10] sm:$0xff]  ;;  %v32_v13 = vld [vmem:[%s718_s1 + $0x20] sm:$0xff] }
   0x4   :  { %v131_v10 = vld [vmem:[%s720_s3 + $0x18] sm:$0xff]  ;;  %421 = vmatprep.subr.bf16.mxu1 %v420_v3  ;;  %v424_v11 = vpack.c.bf16 %v31_v8, %v30_v6  ;;  %v33_v14 = vld [vmem:[%s718_s1 + $0x28] sm:$0xff]  ;;  %v132_v15 = vld [vmem:[%s720_s3 + $0x20] sm:$0xff] }
   0x5   :  { %v458_v12 = vpack.c.bf16 %v131_v10, %v130_v9  ;;  %454 = vmatprep.subr.msk.bf16.mxu0 %vm571_vm1, %v452_v7  ;;  %423 = vmatpush3.bf16.xpose.msra.mxu1 %v420_v3  ;;  %v133_v16 = vld [vmem:[%s720_s3 + $0x28] sm:$0xff]  ;;  %v428_v17 = vpack.c.bf16 %v33_v14, %v32_v13  ;;  %v26_v19 = vld [vmem:[%s717_s0] sm:$0xff] }
   0x6   :  { %457 = vmatpush3.bf16.xpose.msk.msra.mxu0 %vm571_vm1, %v452_v7  ;;  %425 = vmatprep.subr.bf16.mxu1 %v424_v11  ;;  %v464_v18 = vpack.c.bf16 %v133_v16, %v132_v15  ;;  %v126_v20 = vld [vmem:[%s719_s2] sm:$0xff] }
   0x7   :  { %460 = vmatprep.subr.msk.bf16.mxu0 %vm571_vm1, %v458_v12  ;;  %382 = vmatprep.mubr.f32.mxu1 %v26_v19 }
   0xd   :  { %427 = vmatpush3.bf16.xpose.msra.mxu1 %v424_v11 }
   0xe   :  { %9 = vsyncpa [#allocation4], 0  ;;  %463 = vmatpush3.bf16.xpose.msk.msra.mxu0 %vm571_vm1, %v458_v12  ;;  %429 = vmatprep.subr.bf16.mxu1 %v428_v17  ;;  %v34_v21 = vld [vmem:[%s718_s1 + $0x30] sm:$0xff]  ;;  %v35_v22 = vld [vmem:[%s718_s1 + $0x38] sm:$0xff]  ;;  %s529_s7 = smov [#allocation3]  }
   0xf   :  { %466 = vmatprep.subr.msk.bf16.mxu0 %vm571_vm1, %v464_v18  ;;  %417 = vmatprep.mubr.msk.f32.mxu0 %vm144_vm0, %v126_v20  ;;  %v134_v23 = vld [vmem:[%s720_s3 + $0x30] sm:$0xff]  ;;  %v135_v24 = vld [vmem:[%s720_s3 + $0x38] sm:$0xff]  ;;  %v432_v25 = vpack.c.bf16 %v35_v22, %v34_v21  ;;  %v36_v27 = vld [vmem:[%s718_s1 + $0x40] sm:$0xff]  ;;  %s285_s8 = sshll.u32 %s529_s7, 4  ;;  %s286_s8 = int_to_ptr.vmem [resolvable:$true] %s285_s8 }
  0x10   :  { %v470_v26 = vpack.c.bf16 %v135_v24, %v134_v23  ;;  %v37_v28 = vld [vmem:[%s718_s1 + $0x48] sm:$0xff]  ;;  %v136_v29 = vld [vmem:[%s720_s3 + $0x40] sm:$0xff]  ;;  %v38_v33 = vld [vmem:[%s718_s1 + $0x50] sm:$0xff]  ;;  %s505_s9 = scalar_lea.vmem %s286_s8, 256  ;;  %p510_p1 = scmp.lt.s32.totalorder %s286_s8, %s286_s8 }
  0x11   :  { %v137_v30 = vld [vmem:[%s720_s3 + $0x48] sm:$0xff]  ;;  %v436_v31 = vpack.c.bf16 %v37_v28, %v36_v27  ;;  %v39_v34 = vld [vmem:[%s718_s1 + $0x58] sm:$0xff]  ;;  %v138_v35 = vld [vmem:[%s720_s3 + $0x50] sm:$0xff]  ;;  %p506_p0 = scmp.ne.s32.totalorder %s286_s8, %s505_s9  ;;  %p511_p2 = scmp.lt.s32.totalorder %s505_s9, %s505_s9 }
  0x12   :  { %v476_v32 = vpack.c.bf16 %v137_v30, %v136_v29  ;;  %v139_v36 = vld [vmem:[%s720_s3 + $0x58] sm:$0xff]  ;;  %v440_v37 = vpack.c.bf16 %v39_v34, %v38_v33  ;;  %v40_v39 = vld [vmem:[%s718_s1 + $0x60] sm:$0xff]  ;;  %v41_v40 = vld [vmem:[%s718_s1 + $0x68] sm:$0xff] }
  0x13   :  { %v482_v38 = vpack.c.bf16 %v139_v36, %v138_v35  ;;  %v140_v41 = vld [vmem:[%s720_s3 + $0x60] sm:$0xff]  ;;  %v141_v42 = vld [vmem:[%s720_s3 + $0x68] sm:$0xff]  ;;  %v444_v43 = vpack.c.bf16 %v41_v40, %v40_v39  ;;  %v42_v45 = vld [vmem:[%s718_s1 + $0x70] sm:$0xff]  ;;  %p512_p3 = por %p511_p2, %p510_p1 }
  0x14   :  { %v488_v44 = vpack.c.bf16 %v141_v42, %v140_v41  ;;  %v43_v46 = vld [vmem:[%s718_s1 + $0x78] sm:$0xff]  ;;  %v142_v47 = vld [vmem:[%s720_s3 + $0x70] sm:$0xff]  ;;  %v27_v51 = vld [vmem:[%s717_s0 + $0x8] sm:$0xff] }
  0x15   :  { %431 = vmatpush3.bf16.xpose.msra.mxu1 %v428_v17  ;;  %v143_v48 = vld [vmem:[%s720_s3 + $0x78] sm:$0xff]  ;;  %v448_v49 = vpack.c.bf16 %v43_v46, %v42_v45  ;;  %v127_v52 = vld [vmem:[%s719_s2 + $0x8] sm:$0xff]  ;;  %p513_p4 = pnand %p512_p3, %p506_p0 }
  0x16   :  { %469 = vmatpush3.bf16.xpose.msk.msra.mxu0 %vm571_vm1, %v464_v18  ;;  %433 = vmatprep.subr.bf16.mxu1 %v432_v25  ;;  %v494_v50 = vpack.c.bf16 %v143_v48, %v142_v47 }
  0x17   :  { %472 = vmatprep.subr.msk.bf16.mxu0 %vm571_vm1, %v470_v26 }
  0x1d   :  { %435 = vmatpush3.bf16.xpose.msra.mxu1 %v432_v25 }
  0x1e   :  { %475 = vmatpush3.bf16.xpose.msk.msra.mxu0 %vm571_vm1, %v470_v26  ;;  %437 = vmatprep.subr.bf16.mxu1 %v436_v31 }
  0x1f   :  { %478 = vmatprep.subr.msk.bf16.mxu0 %vm571_vm1, %v476_v32 }
  0x25   :  { %439 = vmatpush3.bf16.xpose.msra.mxu1 %v436_v31 }
  0x26   :  { %481 = vmatpush3.bf16.xpose.msk.msra.mxu0 %vm571_vm1, %v476_v32  ;;  %441 = vmatprep.subr.bf16.mxu1 %v440_v37 }
  0x27   :  { %484 = vmatprep.subr.msk.bf16.mxu0 %vm571_vm1, %v482_v38 }
  0x2d   :  { %443 = vmatpush3.bf16.xpose.msra.mxu1 %v440_v37 }
  0x2e   :  { %487 = vmatpush3.bf16.xpose.msk.msra.mxu0 %vm571_vm1, %v482_v38  ;;  %445 = vmatprep.subr.bf16.mxu1 %v444_v43 }
  0x2f   :  { %490 = vmatprep.subr.msk.bf16.mxu0 %vm571_vm1, %v488_v44 }
  0x35   :  { %447 = vmatpush3.bf16.xpose.msra.mxu1 %v444_v43 }
  0x36   :  { %493 = vmatpush3.bf16.xpose.msk.msra.mxu0 %vm571_vm1, %v488_v44  ;;  %449 = vmatprep.subr.bf16.mxu1 %v448_v49 }
  0x37   :  { %496 = vmatprep.subr.msk.bf16.mxu0 %vm571_vm1, %v494_v50 }
  0x3d   :  { %451 = vmatpush3.bf16.xpose.msra.mxu1 %v448_v49 }
  0x3e   :  { %499 = vmatpush3.bf16.xpose.msk.msra.mxu0 %vm571_vm1, %v494_v50 }
  0x44   :  { %383 = vmatmul.mubr.f32.vlgmr.msra.gmra.mrb[0].mxu1 %v27_v51 }
  0x45   :  { %418 = vmatmul.mubr.msk.f32.vlgmr.msra.gmra.mrb[0].mxu0 %vm144_vm0, %v127_v52 }
 0x117   :  { %v384_v53 = vpop.f32.mrb[0].mxu1 }
 0x118   :  { %v419_v54 = vpop.f32.mrb[0].mxu0  ;;  %v110_v55 = vpop.f32.mrb[1].mxu1 }
 0x119   :  { %v277_v56 = vadd.f32 %v419_v54, %v384_v53  ;;  %v265_v57 = vpop.f32.mrb[1].mxu0 }
 0x11a   :  { %v276_v58 = vadd.f32 %v265_v57, %v110_v55 }
 0x11b   :  { %279 = vst [vmem:[#allocation3 + $0x8] sm:$0xff] %v277_v56 }
 0x11c   :  { %278 = vst [vmem:[#allocation3] sm:$0xff] %v276_v58 }
 0x11d   :  { %516 = shalt.err (!%p513_p4)
}
 0x11e   :  { %s517_s10 = scalar_lea.hbm %s721_s4, 256 }
 0x11f   :  { %p518_p5 = scmp.ne.s32.totalorder %s721_s4, %s517_s10  ;;  %p521_p6 = scmp.lt.u32.totalorder %s517_s10, %s721_s4 }
 0x121   :  { %p523_p7 = pnand %p521_p6, %p518_p5 }
 0x123   :  { %526 = shalt.err (!%p523_p7)
}
 0x124   :  { %s530_s15 = smov 128   ;;  %s531_s16 = smov 8  }
 0x125   :  { %291 = dma.vmem_to_hbm [thread:$0]  %s286_s8, 256, %s721_s4, [#allocation4], %s530_s15, %s530_s15, %s531_s16  }
 0x126   :  { %527 = dma.done.wait [#allocation4], 256  }
 0x127   :  { %528 = vsyncadd [#allocation4], 4294967040 }
 0x128   :  { %295 = vsyncpa [#allocation4], 1 }

</bundles_post_ra>
